<compile_context>
chip_gen: v6e
topology: v6e:2x2x1
jax: 0.10.0
libtpu: 0.0.40
codegen_flags: <defaults>
</compile_context>

<pallas_src>
import functools

import jax
import jax.numpy as jnp
from jax.experimental import pallas as pl
from jax.experimental.pallas import tpu as pltpu


def _round_up(x, m):
    return ((x + m - 1) // m) * m


def _attention_kernel(keys_ref, query_ref, uw_ref, ww_ref, bias_ref, vw_ref,
                      ctx_ref, wts_ref, *, approx_recip):
    """One batch tile.  All dims are the true (unpadded) model dims."""
    bt, s, e_dim = keys_ref.shape
    a_dim = uw_ref.shape[1]

    keys = keys_ref[...]                                     # (bt, S, E) compute dtype

    # --- U = keys @ Uw  (MXU, f32 accumulation) ------------------------------
    # Merging (bt, S) -> bt*S is a pure layout view when S % 8 == 0, otherwise
    # a cheap VMEM relayout; either way no HBM traffic.
    u = jnp.dot(keys.reshape(bt * s, e_dim), uw_ref[...],
                preferred_element_type=jnp.float32)
    u = u.reshape(bt, s, a_dim)                              # (bt, S, A) f32

    # --- W = query @ Ww + (Ub + Wb)  (MXU + VPU) -----------------------------
    w = jnp.dot(query_ref[...], ww_ref[...],
                preferred_element_type=jnp.float32) + bias_ref[...]      # (bt, A)

    # --- combined = tanh(U + W)  (EUP) ---------------------------------------
    # The single EUP is the post-DMA ceiling of this kernel, so the (bt, S, A)
    # slab is kept at exactly the true problem size (no padded rows/lanes).
    combined = jnp.tanh(u + w[:, None, :])                   # (bt, S, A) f32

    # --- score = <combined, v>  (VPU mul + lane reduce) ----------------------
    # V-layer bias dropped: softmax is shift-invariant, so it cannot change
    # either output.
    score = jnp.sum(combined * vw_ref[...][None, :, :], axis=-1)         # (bt, S)

    # --- softmax over the sequence axis (f32; S is unpadded so no mask) ------
    score = score - jnp.max(score, axis=1, keepdims=True)
    p = jnp.exp(score)
    denom = jnp.sum(p, axis=1, keepdims=True)
    weights = p * pl.reciprocal(denom, approx=approx_recip)              # (bt, S)

    # --- context = sum_s weights * keys  (VPU broadcast-mul + sublane reduce;
    # keeps the MXU/vext slot free and overlaps with the next tile's tanh) ----
    ctx = jnp.sum(keys.astype(jnp.float32) * weights[:, :, None], axis=1)  # (bt, E)

    ctx_ref[...] = ctx.astype(ctx_ref.dtype)
    wts_ref[...] = weights.astype(wts_ref.dtype)


def _choose_b_tile(B, S, E, A, keys_itemsize,
                   target_keys_block_bytes=2 << 20,     # ~2 MiB keys DMA per step
                   vmem_live_budget=24 << 20):          # conservative vs v7x 64 MiB
    """Batch tile: big enough to amortize per-step pipeline overhead and fill
    MXU rows, small enough for the v7x VMEM budget, and split so the v7x
    megacore sees at least two parallel tiles."""
    per_row = (2 * S * E * keys_itemsize      # double-buffered keys block
               + 3 * S * A * 4                # u / tanh / exp f32 intermediates
               + 2 * (S + E) * 4)             # weights + context (+ slack)
    bt = min(vmem_live_budget // max(per_row, 1),
             target_keys_block_bytes // max(S * E * keys_itemsize, 1),
             512)
    bt = max(8, (int(bt) // 8) * 8)
    bt = min(bt, _round_up(B, 8))             # never bigger than the (8-rounded) batch
    if B > 8 and pl.cdiv(B, bt) < 2:          # give both v7x TensorCores work
        bt = max(8, _round_up(pl.cdiv(B, 2), 8))
    return bt


def attention_forward(keys, query, params, *, b_tile=None, interpret=False):
    """keys: (B, S, E), query: (B, D) -> (context (B, E) f32, weights (B, S) f32).

    The kernel computes with keys.dtype MXU inputs and f32 accumulation.  To use
    the reduced-bandwidth path, cast keys to bf16 ONCE outside this call (per
    sequence, not per decode step).
    """
    B, S, E = keys.shape
    D = query.shape[1]
    uw_t, ub, ww_t, wb, vw, _vb = params      # _vb unused: softmax shift-invariance
    A = uw_t.shape[1]

    cdt = keys.dtype
    query = query.astype(cdt)
    uw = uw_t.astype(cdt)                     # tiny (E, A) / (D, A) weight casts only
    ww = ww_t.astype(cdt)
    bias = (ub + wb).astype(jnp.float32)      # (1, A) — Ub + Wb folded
    vw_f = vw.astype(jnp.float32)             # (1, A)

    if b_tile is None:
        b_tile = _choose_b_tile(B, S, E, A, jnp.dtype(cdt).itemsize)
    # Ragged last batch tile: pad rows are computed on unspecified data
    # (row-independent math) and dropped on the out-of-bounds store.
    grid = (pl.cdiv(B, b_tile),)

    # Exact reciprocal on the f32 validation path; EUP approx on narrow paths.
    approx_recip = jnp.dtype(cdt) != jnp.dtype(jnp.float32)
    kernel = functools.partial(_attention_kernel, approx_recip=approx_recip)

    ctx, wts = pl.pallas_call(
        kernel,
        out_shape=(
            jax.ShapeDtypeStruct((B, E), jnp.float32),   # context
            jax.ShapeDtypeStruct((B, S), jnp.float32),   # weights
        ),
        grid_spec=pltpu.PrefetchScalarGridSpec(
            num_scalar_prefetch=0,
            grid=grid,
            in_specs=[
                pl.BlockSpec((b_tile, S, E), lambda i: (i, 0, 0)),   # keys (unpadded)
                pl.BlockSpec((b_tile, D), lambda i: (i, 0)),         # query
                pl.BlockSpec((E, A), lambda i: (0, 0)),              # Uw^T
                pl.BlockSpec((D, A), lambda i: (0, 0)),              # Ww^T
                pl.BlockSpec((1, A), lambda i: (0, 0)),              # Ub + Wb
                pl.BlockSpec((1, A), lambda i: (0, 0)),              # Vw
            ],
            out_specs=[
                pl.BlockSpec((b_tile, E), lambda i: (i, 0)),
                pl.BlockSpec((b_tile, S), lambda i: (i, 0)),
            ],
        ),
        compiler_params=pltpu.CompilerParams(
            dimension_semantics=("parallel",),       # megacore-split batch tiles (v7x)
            vmem_limit_bytes=48 * 1024 * 1024,       # > tile budget, <= v7x 64 MiB
        ),
        interpret=interpret,
    )(keys, query, uw, ww, bias, vw_f)

    return ctx, wts


def init_params(key, attention_dim, encoder_dim, decoder_dim):
    """Deterministic synthetic parameters (same shapes as torch.nn.Linear)."""
    kU, kUb, kW, kWb, kV, kVb = jax.random.split(key, 6)
    A, E, D = attention_dim, encoder_dim, decoder_dim
    # Stored pre-transposed so the kernel does x @ W (lane-dense last dim = A).
    uw_t = jax.random.normal(kU, (E, A), jnp.float32) * 0.1
    ub = jax.random.normal(kUb, (1, A), jnp.float32) * 0.1
    ww_t = jax.random.normal(kW, (D, A), jnp.float32) * 0.1
    wb = jax.random.normal(kWb, (1, A), jnp.float32) * 0.1
    vw = jax.random.normal(kV, (1, A), jnp.float32) * 0.1
    vb = jax.random.normal(kVb, (1, 1), jnp.float32) * 0.1
    return uw_t, ub, ww_t, wb, vw, vb


def reference_forward(keys, query, params):
    """Pure-JAX reference mirroring the PyTorch module exactly (including vb)."""
    uw_t, ub, ww_t, wb, vw, vb = params
    u = keys @ uw_t + ub                                  # (B, S, A)
    w = query @ ww_t + wb                                 # (B, A)
    combined = jnp.tanh(u + w[:, None, :])
    score = jnp.sum(combined * vw[None, :, :], axis=-1) + vb[0, 0]     # (B, S)
    weights = jax.nn.softmax(score, axis=1)
    context = jnp.sum(keys * weights[:, :, None], axis=1)
    return context, weights


if __name__ == "__main__":
    attention_dim, encoder_dim, decoder_dim = 32, 32, 16
    B, S = 12, 8   # b_tile -> 8, grid of 2 batch tiles (exercises the pipeline)

    root = jax.random.PRNGKey(0)
    kp, kk, kq = jax.random.split(root, 3)
    params = init_params(kp, attention_dim, encoder_dim, decoder_dim)
    keys = jax.random.normal(kk, (B, S, encoder_dim), jnp.float32)
    query = jax.random.normal(kq, (B, decoder_dim), jnp.float32)

    ctx_ref, wts_ref = reference_forward(keys, query, params)

    # Full-precision path (exact reciprocal): tight check.
    context, weights = attention_forward(keys, query, params)
    jax.block_until_ready((context, weights))
    assert context.shape == (B, encoder_dim) and weights.shape == (B, S)
    assert jnp.allclose(context, ctx_ref, atol=1e-4, rtol=1e-4)
    assert jnp.allclose(weights, wts_ref, atol=1e-4, rtol=1e-4)

    # Reduced-bandwidth path: keys cast to bf16 ONCE (hoisted out of the
    # per-call wrapper), f32 accumulation, approx EUP reciprocal (weights may
    # not sum to exactly 1.0 on this path).
    keys_bf16 = keys.astype(jnp.bfloat16)
    ctx_bf, wts_bf = attention_forward(keys_bf16, query, params)
    jax.block_until_ready((ctx_bf, wts_bf))
    assert jnp.allclose(ctx_bf, ctx_ref, atol=3e-2, rtol=3e-2)
    assert jnp.allclose(wts_bf, wts_ref, atol=3e-2, rtol=3e-2)

    print("KERNEL_OK")
</pallas_src>

<mosaic_0001>
module attributes {stable_mosaic.version = 11 : i64} {
  func.func @_attention_kernel(%arg0: i32, %arg1: memref<8x8x32xf32, #tpu.memory_space<vmem>>, %arg2: memref<8x16xf32, #tpu.memory_space<vmem>>, %arg3: memref<32x32xf32, #tpu.memory_space<vmem>>, %arg4: memref<16x32xf32, #tpu.memory_space<vmem>>, %arg5: memref<1x32xf32, #tpu.memory_space<vmem>>, %arg6: memref<1x32xf32, #tpu.memory_space<vmem>>, %arg7: memref<8x32xf32, #tpu.memory_space<vmem>>, %arg8: memref<8x8xf32, #tpu.memory_space<vmem>>) attributes {dimension_semantics = [#tpu.dimension_semantics<parallel>], iteration_bounds = array<i64: 2>, scalar_prefetch = 0 : i64, scratch_operands = 0 : i64, tpu.core_type = #tpu.core_type<tc>, window_params = [{transform_indices = @transform_0, window_bounds = array<i64: 8, 8, 32>}, {transform_indices = @transform_1, window_bounds = array<i64: 8, 16>}, {pipeline_mode = #tpu.pipeline_mode<synchronous>, transform_indices = @transform_2, window_bounds = array<i64: 32, 32>}, {pipeline_mode = #tpu.pipeline_mode<synchronous>, transform_indices = @transform_3, window_bounds = array<i64: 16, 32>}, {pipeline_mode = #tpu.pipeline_mode<synchronous>, transform_indices = @transform_4, window_bounds = array<i64: 1, 32>}, {pipeline_mode = #tpu.pipeline_mode<synchronous>, transform_indices = @transform_5, window_bounds = array<i64: 1, 32>}, {transform_indices = @transform_6, window_bounds = array<i64: 8, 32>}, {transform_indices = @transform_7, window_bounds = array<i64: 8, 8>}]} {
    %c0 = arith.constant 0 : index
    %c0_0 = arith.constant 0 : index
    %c0_1 = arith.constant 0 : index
    %0 = vector.load %arg1[%c0, %c0_0, %c0_1] : memref<8x8x32xf32, #tpu.memory_space<vmem>>, vector<8x8x32xf32>
    %1 = vector.shape_cast %0 : vector<8x8x32xf32> to vector<64x32xf32>
    %c0_2 = arith.constant 0 : index
    %c0_3 = arith.constant 0 : index
    %2 = vector.load %arg3[%c0_2, %c0_3] : memref<32x32xf32, #tpu.memory_space<vmem>>, vector<32x32xf32>
    %cst = arith.constant dense<0.000000e+00> : vector<64x32xf32>
    %3 = tpu.matmul %1, %2, %cst {dimension_numbers = #tpu.dot_dimension_numbers<[1], [0], [0], [1], [0, 0, 1, 1], [], []>} : vector<64x32xf32>, vector<32x32xf32>, vector<64x32xf32> -> vector<64x32xf32>
    %4 = vector.shape_cast %3 : vector<64x32xf32> to vector<8x8x32xf32>
    %c0_4 = arith.constant 0 : index
    %c0_5 = arith.constant 0 : index
    %5 = vector.load %arg2[%c0_4, %c0_5] : memref<8x16xf32, #tpu.memory_space<vmem>>, vector<8x16xf32>
    %c0_6 = arith.constant 0 : index
    %c0_7 = arith.constant 0 : index
    %6 = vector.load %arg4[%c0_6, %c0_7] : memref<16x32xf32, #tpu.memory_space<vmem>>, vector<16x32xf32>
    %cst_8 = arith.constant dense<0.000000e+00> : vector<8x32xf32>
    %7 = tpu.matmul %5, %6, %cst_8 {dimension_numbers = #tpu.dot_dimension_numbers<[1], [0], [0], [1], [0, 0, 1, 1], [], []>} : vector<8x16xf32>, vector<16x32xf32>, vector<8x32xf32> -> vector<8x32xf32>
    %c0_9 = arith.constant 0 : index
    %c0_10 = arith.constant 0 : index
    %8 = vector.load %arg5[%c0_9, %c0_10] : memref<1x32xf32, #tpu.memory_space<vmem>>, vector<1x32xf32>
    %9 = vector.broadcast %8 : vector<1x32xf32> to vector<8x32xf32>
    %10 = arith.addf %7, %9 : vector<8x32xf32>
    %11 = vector.shape_cast %10 : vector<8x32xf32> to vector<8x1x32xf32>
    %12 = vector.broadcast %11 : vector<8x1x32xf32> to vector<8x8x32xf32>
    %13 = arith.addf %4, %12 : vector<8x8x32xf32>
    %14 = math.tanh %13 : vector<8x8x32xf32>
    %c0_11 = arith.constant 0 : index
    %c0_12 = arith.constant 0 : index
    %15 = vector.load %arg6[%c0_11, %c0_12] : memref<1x32xf32, #tpu.memory_space<vmem>>, vector<1x32xf32>
    %16 = vector.shape_cast %15 : vector<1x32xf32> to vector<1x1x32xf32>
    %17 = vector.broadcast %16 : vector<1x1x32xf32> to vector<8x8x32xf32>
    %18 = arith.mulf %14, %17 : vector<8x8x32xf32>
    %cst_13 = arith.constant dense<0.000000e+00> : vector<8x8xf32>
    %19 = vector.multi_reduction <add>, %18, %cst_13 [2] : vector<8x8x32xf32> to vector<8x8xf32>
    %cst_14 = arith.constant dense<0xFF800000> : vector<8xf32>
    %20 = vector.multi_reduction <maximumf>, %19, %cst_14 [1] : vector<8x8xf32> to vector<8xf32>
    %21 = vector.shape_cast %20 : vector<8xf32> to vector<8x1xf32>
    %22 = vector.broadcast %21 : vector<8x1xf32> to vector<8x8xf32>
    %23 = arith.subf %19, %22 : vector<8x8xf32>
    %24 = math.exp %23 : vector<8x8xf32>
    %cst_15 = arith.constant dense<0.000000e+00> : vector<8xf32>
    %25 = vector.multi_reduction <add>, %24, %cst_15 [1] : vector<8x8xf32> to vector<8xf32>
    %26 = vector.shape_cast %25 : vector<8xf32> to vector<8x1xf32>
    %27 = tpu.reciprocal %26 : vector<8x1xf32> -> vector<8x1xf32>
    %28 = vector.broadcast %27 : vector<8x1xf32> to vector<8x8xf32>
    %29 = arith.mulf %24, %28 : vector<8x8xf32>
    %30 = vector.shape_cast %29 : vector<8x8xf32> to vector<8x8x1xf32>
    %31 = vector.broadcast %30 : vector<8x8x1xf32> to vector<8x8x32xf32>
    %32 = arith.mulf %0, %31 : vector<8x8x32xf32>
    %cst_16 = arith.constant dense<0.000000e+00> : vector<8x32xf32>
    %33 = vector.multi_reduction <add>, %32, %cst_16 [1] : vector<8x8x32xf32> to vector<8x32xf32>
    %c0_17 = arith.constant 0 : index
    %c0_18 = arith.constant 0 : index
    %34 = vector.load %arg7[%c0_17, %c0_18] : memref<8x32xf32, #tpu.memory_space<vmem>>, vector<8x32xf32>
    tpu.vector_store %arg7[%c0_17, %c0_18], %33 {strides = array<i32>} : memref<8x32xf32, #tpu.memory_space<vmem>>, vector<8x32xf32>,
    %c0_19 = arith.constant 0 : index
    %c0_20 = arith.constant 0 : index
    %35 = vector.load %arg8[%c0_19, %c0_20] : memref<8x8xf32, #tpu.memory_space<vmem>>, vector<8x8xf32>
    tpu.vector_store %arg8[%c0_19, %c0_20], %29 {strides = array<i32>} : memref<8x8xf32, #tpu.memory_space<vmem>>, vector<8x8xf32>,
    return
  }
  func.func @transform_0(%arg0: i32) -> (i32, i32, i32) {
    %c0_i32 = arith.constant 0 : i32
    %c0_i32_0 = arith.constant 0 : i32
    %c0_i32_1 = arith.constant 0 : i32
    return %arg0, %c0_i32, %c0_i32_0 : i32, i32, i32
  }
  func.func @transform_1(%arg0: i32) -> (i32, i32) {
    %c0_i32 = arith.constant 0 : i32
    %c0_i32_0 = arith.constant 0 : i32
    return %arg0, %c0_i32 : i32, i32
  }
  func.func @transform_2(%arg0: i32) -> (i32, i32) {
    %c0_i32 = arith.constant 0 : i32
    %c0_i32_0 = arith.constant 0 : i32
    %c0_i32_1 = arith.constant 0 : i32
    return %c0_i32, %c0_i32_0 : i32, i32
  }
  func.func @transform_3(%arg0: i32) -> (i32, i32) {
    %c0_i32 = arith.constant 0 : i32
    %c0_i32_0 = arith.constant 0 : i32
    %c0_i32_1 = arith.constant 0 : i32
    return %c0_i32, %c0_i32_0 : i32, i32
  }
  func.func @transform_4(%arg0: i32) -> (i32, i32) {
    %c0_i32 = arith.constant 0 : i32
    %c0_i32_0 = arith.constant 0 : i32
    %c0_i32_1 = arith.constant 0 : i32
    return %c0_i32, %c0_i32_0 : i32, i32
  }
  func.func @transform_5(%arg0: i32) -> (i32, i32) {
    %c0_i32 = arith.constant 0 : i32
    %c0_i32_0 = arith.constant 0 : i32
    %c0_i32_1 = arith.constant 0 : i32
    return %c0_i32, %c0_i32_0 : i32, i32
  }
  func.func @transform_6(%arg0: i32) -> (i32, i32) {
    %c0_i32 = arith.constant 0 : i32
    %c0_i32_0 = arith.constant 0 : i32
    return %arg0, %c0_i32 : i32, i32
  }
  func.func @transform_7(%arg0: i32) -> (i32, i32) {
    %c0_i32 = arith.constant 0 : i32
    %c0_i32_0 = arith.constant 0 : i32
    return %arg0, %c0_i32 : i32, i32
  }
}

</mosaic_0001>

<bundles_post_ra>
// kernel: tpu_custom_call.1
= control target key start
LH: loop header
LB: loop body
LE: loop exit
PB: predicated region body
PF: predicated region fallthrough
CT: control target
= control target key end

     0   :  { %s2180_s0 = inlined_call_operand.hbm [shape: f32[12,8,32], index: 0, kind: input, shape index: {}]   ;;  %s2181_s1 = inlined_call_operand.hbm [shape: f32[12,16], index: 1, kind: input, shape index: {}]   ;;  %s2182_s2 = inlined_call_operand.hbm [shape: f32[32,32], index: 2, kind: input, shape index: {}]   ;;  %s2183_s3 = inlined_call_operand.hbm [shape: f32[16,32], index: 3, kind: input, shape index: {}]   ;;  %s2184_s4 = inlined_call_operand.vmem [shape: f32[1,32], index: 4, kind: input, shape index: {}]   ;;  %s2185_s5 = inlined_call_operand.vmem [shape: f32[1,32], index: 5, kind: input, shape index: {}]   ;;  %s2186_s6 = inlined_call_operand.hbm [shape: f32[12,32], index: 6, kind: output, shape index: {0}]   ;;  %s2187_s7 = inlined_call_operand.vmem [shape: f32[12,8], index: 7, kind: output, shape index: {1}]  }
   0x1   :  { %2192 = sst [smem:[#allocation17_spill]] %s2180_s0 }
   0x2   :  { %2193 = sst [smem:[#allocation18_spill]] %s2182_s2 }
   0x3   :  { %2194 = sst [smem:[#allocation19_spill]] %s2183_s3 }
   0x4   :  { %13 = vsyncpa [#allocation3], 0 }
   0x5   :  { %15 = vsyncpa [#allocation3 + $0x1], 0 }
   0x6   :  { %16 = vsyncpa [#allocation6], 0 }
   0x7   :  { %18 = vsyncpa [#allocation6 + $0x1], 0 }
   0x8   :  { %19 = vsyncpa [#allocation9], 0 }
   0x9   :  { %20 = vsyncpa [#allocation4], 0 }
   0xa   :  { %22 = vsyncpa [#allocation4 + $0x1], 0  ;;  %s1755_s24 = smov 0   ;;  %s1757_s25 = smov 0  }
   0xb   :  { %s1759_s26 = smov 0   ;;  %s1761_s27 = smov 0  }
   0xc LB: > { %s1776_s28 = sadd.s32 4294967295, %s1700_s27   ;;  %s1326_s29 = sadd.s32 4294967294, %s1700_s27   ;;  %s1700_s27 = sphi %s1761_s27, %s2217_s27   ;;  %s1696_s26 = sphi %s1759_s26, %s2216_s26   ;;  %s1692_s25 = sphi %s1757_s25, %s2215_s25   ;;  %s1688_s24 = sphi %s1755_s24, %s2214_s24  }
   0xd   : > { %s1780_s30 = sadd.s32 1, %s1700_s27   ;;  %s35_s8 = sadd.s32 1, %s1696_s26 }
   0xe   : > { %s32_s9 = ssub.s32 %s1700_s27, %s1780_s30  ;;  %p42_p0 = scmp.ne.s32.totalorder %s1696_s26, %s1692_s25 }
   0xf   : > { %p33_p1 = scmp.eq.s32.totalorder %s32_s9, 0  ;;  %p43_p2 = scmp.eq.s32.totalorder %s1700_s27, 0 }
  0x10   : > { %p48_p3 = scmp.ne.s32.totalorder %s1692_s25, %s1688_s24  ;;  %p2188_p4 = scmp.eq.s32.totalorder %s1776_s28, 0 }
  0x11   : > { %s1792_s10 = scalar_select %p33_p1, %s1696_s26, %s35_s8  }
  0x12   : > { %p1794_p5 = por %p43_p2, %p42_p0  ;;  %p1800_p6 = por %p2188_p4, %p48_p3 }
  0x13   : > { %2195 = sst [smem:[#allocation16_spill]] %s1792_s10  ;;  %p182_p7 = scmp.eq.s32.totalorder %s1776_s28, 1 }
  0x14   : > { %s2197_s12 = scalar_select %p1800_p6, 1, 0 }
  0x15   : > { %p188_p8 = scmp.eq.s32.totalorder %s1326_s29, 1  ;;  %p1327_p9 = scmp.ge.s32.totalorder %s1700_s27, 1 }
  0x16   : > { %p221_p10 = scmp.lt.s32.totalorder %s1700_s27, 3  ;;  %p1807_p11 = por %p182_p7, %p42_p0 }
  0x17   : > { %p1811_p12 = por %p188_p8, %p48_p3  ;;  %s1702_s16 = smov [#allocation7]  }
  0x18   : > { %s2198_s13 = scalar_select %p1807_p11, 1, 0 }
  0x19   : > { %s2199_s14 = scalar_select %p1811_p12, 1, 0 }
  0x1a   : > { %p1815_p13 = pnand %p1327_p9, %p221_p10  ;;  %s233_s17 = sshll.u32 %s1702_s16, 4  ;;  %s234_s17 = int_to_ptr.vmem [resolvable:$true] %s233_s17 }
  0x1b   : > { %s1703_s19 = smov [#allocation8]   ;;  %s1531_s21 = scalar_lea.vmem %s234_s17, 512 }
  0x1c   : > { %p1426_p1 = pneg %p1815_p13  ;;  %s246_s20 = sshll.u32 %s1703_s19, 4  ;;  %s247_s20 = int_to_ptr.vmem [resolvable:$true] %s246_s20 }
  0x1d   : > { %p1532_p3 = scmp.ne.s32.totalorder %s234_s17, %s1531_s21  ;;  %p1539_p9 = scmp.lt.s32.totalorder %s234_s17, %s234_s17 }
  0x1e   : > { %p1823_p2 = pnand %p1426_p1, %p2188_p4  ;;  %p1540_p10 = scmp.lt.s32.totalorder %s1531_s21, %s1531_s21 }
  0x20   : > { %p1522_p0 = pneg %p1823_p2  ;;  %p1541_p12 = por %p1540_p10, %p1539_p9 }
  0x22   : > { %p1534_p7 = pnand %p1532_p3, %p1522_p0 }
  0x24   : > { %p1535_p8 = pneg %p1534_p7 }
  0x26   : > { %p1542_p1 = pnand %p1541_p12, %p1535_p8 }
  0x28   : > { %1545 = shalt.err (!%p1542_p1)
}
  0x29   : > { %s1704_s22 = smov 128   ;;  %s1705_s23 = smov 8  }
  0x2a   : > { %s2202_s2 = sld [smem:[#allocation18_spill]]  ;;  %s1557_s9 = scalar_lea.vmem %s247_s20, 256 }
  0x2b   : > { %p1558_p4 = scmp.ne.s32.totalorder %s247_s20, %s1557_s9  ;;  %p1565_p11 = scmp.lt.s32.totalorder %s247_s20, %s247_s20 }
  0x2c   : > { %p1566_p6 = scmp.lt.s32.totalorder %s1557_s9, %s1557_s9 }
  0x2d   : > { %p1560_p3 = pnand %p1558_p4, %p1522_p0 }
  0x2e   : > { %p1567_p9 = por %p1566_p6, %p1565_p11 }
  0x2f   : > { %p1561_p7 = pneg %p1560_p3 }
  0x30   : > { %1429 = dma.hbm_to_vmem [thread:$0]  (!%p1823_p2), %s2202_s2, 512, %s234_s17, [#allocation6], %s1704_s22, %s1704_s22, %s1705_s23  }
  0x31   : > { %p1568_p12 = pnand %p1567_p9, %p1561_p7 }
  0x33   : > { %1571 = shalt.err (!%p1568_p12)
}
  0x34   : > { %s2203_s3 = sld [smem:[#allocation19_spill]]  ;;  %p2191_p8 = scmp.ge.s32.totalorder %s1700_s27, 2 }
  0x36   : > { %262 = sbr.rel (%p2191_p8) target bundleno = 122 (0x7a), region = 32 }
  0x3a   : > { %1432 = dma.hbm_to_vmem [thread:$0]  (!%p1823_p2), %s2203_s3, 256, %s247_s20, [#allocation9], %s1704_s22, %s1704_s22, %s1705_s23  }
  0x3b   : > { %265 = sbr.rel (!%p1794_p5) target bundleno = 97 (0x61), region = 36  ;;  %s266_s17 = sand.u32 (%p1794_p5), 1, %s1696_s26  }
  0x3c   : > { %s1332_s21 = sshll.u32 (%p1794_p5), %s1700_s27, 3  ;;  %s1331_s29 = sshll.u32 (%p1794_p5), %s266_s17, 6 }
  0x3d   : > { %s272_s8 = ssub.s32 (%p1794_p5), 12, %s1332_s21  ;;  %s1855_s22 = scalar_lea.sflag (%p1794_p5), [#allocation3], %s266_s17 }
  0x3e   : > { %p273_p4 = scmp.lt.s32.totalorder (%p1794_p5), %s272_s8, 8  ;;  %s270_s23 = scalar_lea.vmem (%p1794_p5), [#allocation2], %s1331_s29 }
  0x40   : > { %s2219_s8 = smov (!%p273_p4, %s272_s8), 8 }
  0x41   : > { %s1852_s18 = sshll.u32 %s2219_s8, 7 }
  0x42   : > { %s277_s20 = ssub.s32 1024, %s1852_s18 }
  0x43   : > { %278 = vsyncadd %s1855_s22, %s277_s20  ;;  %p1334_p6 = scmp.ne.s32.totalorder %s1852_s18, 0  ;;  %s1362_s9 = sshll.u32 %s1700_s27, 10 }
  0x44   : > { %s2204_s0 = sld [smem:[#allocation17_spill]]  ;;  %s283_s8 = sshll.u32 %s270_s23, 4  ;;  %s1865_s8 = int_to_ptr.vmem [resolvable:$true] %s283_s8 }
  0x4a   : > { %s1863_s21 = scalar_lea.hbm %s2204_s0, %s1362_s9  ;;  %s1576_s2 = scalar_lea.hbm %s2204_s0, 1536 }
  0x4b   : > { %s1572_s17 = scalar_lea.hbm %s1863_s21, %s1852_s18  ;;  %p1577_p10 = scmp.lt.s32.totalorder %s1863_s21, %s2204_s0 }
  0x4c   : > { %p1573_p11 = scmp.ne.s32.totalorder %s1863_s21, %s1572_s17  ;;  %p1578_p1 = scmp.lt.s32.totalorder %s1576_s2, %s1572_s17 }
  0x4e   : > { %p1574_p2 = pnand %p1573_p11, %p1334_p6  ;;  %p1579_p3 = por %p1578_p1, %p1577_p10 }
  0x50   : > { %p1575_p0 = pneg %p1574_p2 }
  0x52   : > { %p1580_p7 = pnand %p1579_p3, %p1575_p0 }
  0x54   : > { %1583 = shalt.err (!%p1580_p7)
}
  0x55   : > { %s1584_s23 = scalar_lea.vmem %s1865_s8, %s1852_s18  ;;  %s1706_s9 = smov [#allocation2]  }
  0x56   : > { %p1585_p9 = scmp.ne.s32.totalorder %s1865_s8, %s1584_s23  ;;  %s1588_s16 = sshll.u32 %s1706_s9, 4  ;;  %s1589_s16 = int_to_ptr.vmem [resolvable:$false] %s1588_s16 }
  0x57   : > { %s1590_s19 = scalar_lea.vmem %s1589_s16, 2048  ;;  %p1591_p11 = scmp.lt.s32.totalorder %s1865_s8, %s1589_s16 }
  0x58   : > { %p1586_p12 = pnand %p1585_p9, %p1334_p6  ;;  %p1592_p2 = scmp.lt.s32.totalorder %s1590_s19, %s1584_s23 }
  0x5a   : > { %p1587_p4 = pneg %p1586_p12  ;;  %p1593_p8 = por %p1592_p2, %p1591_p11 }
  0x5c   : > { %p1594_p10 = pnand %p1593_p8, %p1587_p4 }
  0x5e   : > { %1597 = shalt.err (!%p1594_p10)
}
  0x5f   : > { %s1707_s2 = smov 128   ;;  %s1708_s3 = smov 8  }
  0x60   : > { %289 = dma.hbm_to_vmem [thread:$0]  (%p1334_p6), %s1863_s21, %s1852_s18, %s1865_s8, %s1855_s22, %s1707_s2, %s1707_s2, %s1708_s3  }
  0x61 PF: > { %s293_s10 = sand.u32 1, %s1700_s27   ;;  %s295_s17 = sand.u32 1, %s1696_s26  }
  0x62   : > { %s1338_s29 = sshll.u32 %s295_s17, 3  ;;  %s1339_s20 = sshll.u32 %s1700_s27, 7 }
  0x63   : > { %s1897_s16 = scalar_lea.hbm %s2181_s1, %s1339_s20  ;;  %s297_s19 = scalar_lea.vmem [#allocation5], %s1338_s29 }
  0x64   : > { %s304_s0 = sshll.u32 %s297_s19, 4  ;;  %s294_s18 = scalar_lea.sflag [#allocation6], %s293_s10  ;;  %s305_s0 = int_to_ptr.vmem [resolvable:$true] %s304_s0 }
  0x65   : > { %s1598_s22 = scalar_lea.hbm %s1897_s16, 128  ;;  %s1602_s2 = scalar_lea.hbm %s2181_s1, 256 }
  0x66   : > { %p1599_p8 = scmp.ne.s32.totalorder %s1897_s16, %s1598_s22  ;;  %p1603_p1 = scmp.lt.s32.totalorder %s1897_s16, %s2181_s1 }
  0x67   : > { %p1604_p3 = scmp.lt.s32.totalorder %s1602_s2, %s1598_s22 }
  0x68   : > { %p1600_p6 = pnand %p1599_p8, %p1794_p5 }
  0x69   : > { %p1605_p7 = por %p1604_p3, %p1603_p1 }
  0x6a   : > { %p1601_p0 = pneg %p1600_p6 }
  0x6c   : > { %p1606_p9 = pnand %p1605_p7, %p1601_p0 }
  0x6e   : > { %1609 = shalt.err (!%p1606_p9)
}
  0x6f   : > { %s1610_s29 = scalar_lea.vmem %s305_s0, 128  ;;  %s1709_s10 = smov [#allocation5]  }
  0x70   : > { %p1611_p12 = scmp.ne.s32.totalorder %s305_s0, %s1610_s29  ;;  %s1614_s20 = sshll.u32 %s1709_s10, 4  ;;  %s1615_s20 = int_to_ptr.vmem [resolvable:$false] %s1614_s20 }
  0x71   : > { %s1616_s23 = scalar_lea.vmem %s1615_s20, 256  ;;  %p1617_p2 = scmp.lt.s32.totalorder %s305_s0, %s1615_s20 }
  0x72   : > { %p1612_p4 = pnand %p1611_p12, %p1794_p5  ;;  %p1618_p10 = scmp.lt.s32.totalorder %s1616_s23, %s1610_s29 }
  0x74   : > { %p1613_p11 = pneg %p1612_p4  ;;  %p1619_p8 = por %p1618_p10, %p1617_p2 }
  0x76   : > { %p1620_p6 = pnand %p1619_p8, %p1613_p11 }
  0x78   : > { %1623 = shalt.err (!%p1620_p6)
}
  0x79   : > { %1417 = dma.hbm_to_vmem [thread:$0]  (%p1794_p5), %s1897_s16, 128, %s305_s0, %s294_s18  }
  0x7a PF: > { %313 = sbr.rel (%p1815_p13) target bundleno = 1174 (0x496), region = 44  ;;  %s1918_s9 = sand.u32 (!%p1815_p13), 1, %s1692_s25  }
  0x7b   : > { %s1341_s19 = sshll.u32 (!%p1815_p13), %s1918_s9, 6  ;;  %s316_s22 = scalar_lea.sflag (!%p1815_p13), [#allocation3], %s1918_s9 }
  0x7c   : > { %s1922_s21 = scalar_lea.vmem (!%p1815_p13), [#allocation2], %s1341_s19  ;;  %p2205_p0 = scmp.ne.s32.totalorder (!%p1815_p13), %s2197_s12, 0 }
  0x7f   : > { %1667 = dma.done.wait (%p2205_p0), %s316_s22, 1024  }
  0x80   : > { %1669 = vsyncadd (%p2205_p0), %s316_s22, 4294966272  ;;  %s324_s0 = sand.u32 1, %s1776_s28   ;;  %s1342_s11 = sshll.u32 %s1918_s9, 3 }
  0x81   : > { %s325_s15 = scalar_lea.sflag [#allocation6], %s324_s0  ;;  %s1932_s16 = scalar_lea.vmem [#allocation5], %s1342_s11 }
  0x82   : > { %1671 = dma.done.wait (%p2205_p0), %s325_s15, 128  }
  0x83   : > { %1673 = vsyncadd (%p2205_p0), %s325_s15, 4294967168  ;;  %p2206_p5 = scmp.eq.s32.totalorder %s1776_s28, 0 }
  0x85   : > { %1675 = dma.done.wait (%p2206_p5), [#allocation6], 512   ;;  %p2207_p13 = pmov %p2206_p5 }
  0x86   : > { %p2208_p1 = pmov %p2206_p5 }
  0x87   : > { %1677 = vsyncadd (%p2207_p13), [#allocation6], 4294966784 }
  0x88   : > { %1679 = dma.done.wait (%p2208_p1), [#allocation9], 256   ;;  %p2209_p3 = pmov %p2208_p1 }
  0x89   : > { %v396_v0 = vld [vmem:[#allocation7 + $0x18] sm:$0xff]  ;;  %v395_v1 = vld [vmem:[#allocation7 + $0x10] sm:$0xff]  ;;  %v1947_v2 = vld [vmem:[%s1922_s21 + $0x30] sm:$0xff]  ;;  %vm397_vm0 = vcmask 261120   ;;  %v1710_v7 = vmov 0.0   ;;  %vm1711_vm1 = vmmov 0   ;;  %v616_v18 = vlaneseq }
  0x8a   : > { %1681 = vsyncadd (%p2209_p3), [#allocation9], 4294967040  ;;  %1405 = vmatprep.subr.mxu1 %v396_v0  ;;  %1378 = vmatprep.subr.mxu0 %v396_v0  ;;  %v394_v3 = vld [vmem:[#allocation7 + $0x8] sm:$0xff]  ;;  %v393_v4 = vld [vmem:[#allocation7] sm:$0xff]  ;;  %vm537_vm2 = vcmask 130048   ;;  %vm798_vm3 = vcmask 1041409  }
  0x8b   : > { %1409 = vmatpush3.msra.mxu1 %v396_v0  ;;  %1379 = vmatpush3.msra.mxu0 %v396_v0  ;;  %v1952_v5 = vld [vmem:[%s1922_s21 + $0x38] sm:$0xff]  ;;  %v528_v8 = vld [vmem:[#allocation8] sm:$0xff]  ;;  %v1957_v9 = vld [vmem:[%s1922_s21] sm:$0xff]  ;;  %v1712_v16 = vmov 1966171168   ;;  %v1988_v20 = vshrl.u32 %v616_v18, 7 }
  0x8c   : > { %1406 = vmatprep.subr.mxu1 %v395_v1  ;;  %1380 = vmatprep.subr.mxu0 %v395_v1  ;;  %v529_v6 = vld [vmem:[#allocation8 + $0x8] sm:$0xff]  ;;  %v527_v10 = vld [vmem:[%s1932_s16] sm:$0xff]  ;;  %v1964_v12 = vld [vmem:[%s1922_s21 + $0x10] sm:$0xff]  ;;  %v614_v17 = vunpack.c.l.s4 %v1712_v16  ;;  %vm800_vm4 = vcmask 1042434   ;;  %vm802_vm5 = vcmask 1043459   ;;  %vm804_vm6 = vcmask 1044484  }
  0x8d   : > { %1410 = vmatpush3.msra.mxu1 %v395_v1  ;;  %1395 = vmatprep.mubr.msk.f32.mxu1 %vm397_vm0, %v1947_v2  ;;  %v1961_v11 = vld [vmem:[%s1922_s21 + $0x8] sm:$0xff]  ;;  %v1973_v13 = vld [vmem:[%s1922_s21 + $0x18] sm:$0xff]  ;;  %v1976_v14 = vld [vmem:[%s1922_s21 + $0x20] sm:$0xff]  ;;  %v1995_v32 = vsub.s32 0, %v1988_v20  ;;  %vm806_vm7 = vcmask 1045509   ;;  %vm808_vm8 = vcmask 1046534  }
  0x8e   : > { %1407 = vmatprep.subr.mxu1 %v394_v3  ;;  %1381 = vmatpush3.msra.mxu0 %v395_v1  ;;  %v1983_v15 = vld [vmem:[%s1922_s21 + $0x28] sm:$0xff]  ;;  %v615_v19 = vunpack.c.0.s8 %v614_v17  ;;  %v1355_v23 = vld [vmem:[%s2184_s4] ss:$0 sm:$0xff]  ;;  %vm810_vm9 = vcmask 1047559   ;;  %vm813_vm10 = vcmask 64512   ;;  %p381_p7 = scmp.lt.s32.totalorder %s1776_s28, 1 }
  0x8f   : > { %1411 = vmatpush3.msra.mxu1 %v394_v3  ;;  %1382 = vmatprep.subr.mxu0 %v394_v3  ;;  %v1357_v0 = vld [vmem:[%s2185_s5] ss:$0 sm:$0xff]  ;;  %s1359_s23 = sshll.u32 %s1776_s28, 7  ;;  %s369_s19 = scalar_lea.vmem [#allocation10], %s1342_s11 }
  0x90   : > { %1408 = vmatprep.subr.mxu1 %v393_v4  ;;  %1383 = vmatpush3.msra.mxu0 %v394_v3  ;;  %v618_v24 = vsub.s32 %v615_v19, %v1988_v20  ;;  %s2105_s3 = scalar_select %p381_p7, %s1776_s28, 1 }
  0x91   : > { %1412 = vmatpush3.msra.mxu1 %v393_v4  ;;  %1384 = vmatprep.subr.mxu0 %v393_v4  ;;  %s1187_s22 = sshll.u32 %s369_s19, 4  ;;  %s2141_s15 = scalar_lea.hbm %s2186_s6, %s1359_s23  ;;  %s1188_s22 = int_to_ptr.vmem [resolvable:$true] %s1187_s22 }
  0x92   : > { %1396 = vmatmul.mubr.msk.f32.vlgmr.msra.gmra.mxu1 %vm397_vm0, %v1952_v5  ;;  %1398 = vmatprep.subr.mxu1 %v1710_v7  ;;  %s1346_s17 = sshll.u32 %s2105_s3, 3  ;;  %s1170_s28 = scalar_lea.sflag [#allocation4], %s1918_s9 }
  0x93   : > { %1399 = vmatpush3.msra.mxu1 %v529_v6  ;;  %1402 = vmatprep.mubr.msk.f32.mxu1 %vm1711_vm1, %v1710_v7  ;;  %s384_s20 = scalar_lea.vmem %s2187_s7, %s1346_s17  ;;  %s1624_s11 = scalar_lea.vmem %s1188_s22, 128 }
  0x94   : > { %1400 = vmatprep.subr.mxu1 %v1710_v7  ;;  %1385 = vmatpush3.msra.mxu0 %v393_v4  ;;  %p1625_p9 = scmp.ne.s32.totalorder %s1188_s22, %s1624_s11  ;;  %p2210_p12 = scmp.ne.s32.totalorder %s2198_s13, 0 }
  0x95   : > { %1401 = vmatpush3.msra.mxu1 %v528_v8  ;;  %1386 = vmatprep.mubr.msk.f32.mxu0 %vm397_vm0, %v1957_v9  ;;  %s1714_s16 = smov [#allocation10]  }
  0x96   : > { %1403 = vmatmul.mubr.msk.f32.vlgmr.msra.gmra.mxu1 %vm537_vm2, %v527_v10  ;;  %1387 = vmatmul.mubr.msk.f32.vlgmr.msra.gmra.mxu0 %vm397_vm0, %v1961_v11  ;;  %p1626_p4 = pnand %p1625_p9, %p2210_p12  ;;  %s1628_s12 = sshll.u32 %s1714_s16, 4  ;;  %s1629_s12 = int_to_ptr.vmem [resolvable:$false] %s1628_s12 }
  0x97   : > { %1389 = vmatprep.mubr.msk.f32.mxu0 %vm397_vm0, %v1964_v12  ;;  %s1630_s18 = scalar_lea.vmem %s1629_s12, 256  ;;  %p1631_p2 = scmp.lt.s32.totalorder %s1188_s22, %s1629_s12 }
  0x98   : > { %p1627_p11 = pneg %p1626_p4  ;;  %p1632_p10 = scmp.lt.s32.totalorder %s1630_s18, %s1624_s11 }
  0x9a   : > { %1390 = vmatmul.mubr.msk.f32.gmra.mxu0 %vm397_vm0, %v1973_v13  ;;  %p1633_p8 = por %p1632_p10, %p1631_p2 }
  0x9b   : > { %1392 = vmatprep.mubr.msk.f32.mxu0 %vm397_vm0, %v1976_v14 }
  0x9c   : > { %p1634_p6 = pnand %p1633_p8, %p1627_p11 }
  0x9e   : > { %1393 = vmatmul.mubr.msk.f32.gmra.mxu0 %vm397_vm0, %v1983_v15 }
 0x152   : > { %v1397_v21 = vpop.f32.mrf.mxu1 }
 0x154   : > { %v518_v22 = vpop.f32.mrf.mxu1 }
 0x156   : > { %v607_v25 = vpop.f32.mrf.mxu1  ;;  %v1388_v26 = vpop.f32.mrf.mxu0 }
 0x157   : > { %v608_v27 = vadd.f32 %v1355_v23, %v607_v25 }
 0x158   : > { %v1404_v28 = vpop.f32.mrf.mxu1  ;;  %v488_v29 = vpop.f32.mrf.mxu0 }
 0x159   : > { %v612_v30 = vcombine.high %v608_v27, %v608_v27  ;;  %v619_v31 = vrot.slane %v608_v27, %v618_v24 }
 0x15a   : > { %v1391_v33 = vpop.f32.mrf.mxu0 }
 0x15b   : > { %v626_v34 = vrot.slane %v612_v30, %v618_v24  ;;  %v627_v35 = vcombine.high %v619_v31, %v619_v31  ;;  %v635_v36 = vrot.slane %v619_v31, %v618_v24 }
 0x15c   : > { %v498_v37 = vpop.f32.mrf.mxu0 }
 0x15d   : > { %v649_v38 = vrot.slane %v627_v35, %v618_v24  ;;  %v664_v39 = vrot.slane %v635_v36, %v1995_v32  ;;  %v657_v40 = vcombine.high %v635_v36, %v635_v36  ;;  %v628_v41 = vcombine.high %v626_v34, %v626_v34 }
 0x15e   : > { %v1394_v42 = vpop.f32.mrf.mxu0  ;;  %v642_v43 = vrot.slane %v626_v34, %v618_v24  ;;  %v765_v36 = vand.u32 127, %v616_v18 }
 0x15f   : > { %v668_v44 = vrot.slane %v649_v38, %v1995_v32  ;;  %v701_v45 = vadd.f32 %v664_v39, %v488_v29  ;;  %v659_v46 = vcombine.high %v649_v38, %v649_v38  ;;  %v672_v47 = vrot.slane %v657_v40, %v1995_v32 }
 0x160   : > { %v656_v48 = vrot.slane %v628_v41, %v618_v24  ;;  %v508_v49 = vpop.f32.mrf.mxu0  ;;  %v658_v50 = vcombine.high %v642_v43, %v642_v43  ;;  %v680_v51 = vrot.slane %v642_v43, %v1995_v32  ;;  %v2018_v38 = vsub.s32 %v765_v36, %v1988_v20 }
 0x161   : > { %v702_v52 = vadd.f32 %v1388_v26, %v668_v44  ;;  %1486 = vtanh.f32 %v701_v45  ;;  %v676_v53 = vrot.slane %v659_v46, %v1995_v32  ;;  %v703_v54 = vadd.f32 %v672_v47, %v498_v37 }
 0x162   : > { %v660_v55 = vcombine.high %v656_v48, %v656_v48  ;;  %v684_v56 = vrot.slane %v656_v48, %v1995_v32  ;;  %v688_v57 = vrot.slane %v658_v50, %v1995_v32  ;;  %v705_v59 = vadd.f32 %v680_v51, %v508_v49 }
 0x163   : > { %1488 = vtanh.f32 %v702_v52  ;;  %v704_v58 = vadd.f32 %v1391_v33, %v676_v53 }
 0x164   : > { %1490 = vtanh.f32 %v703_v54  ;;  %v692_v60 = vrot.slane %v660_v55, %v1995_v32  ;;  %v706_v61 = vadd.f32 %v1394_v42, %v684_v56  ;;  %v707_v62 = vadd.f32 %v688_v57, %v518_v22 }
 0x165   : > { %1492 = vtanh.f32 %v704_v58 }
 0x166   : > { %1494 = vtanh.f32 %v705_v59  ;;  %v708_v63 = vadd.f32 %v1397_v21, %v692_v60 }
 0x167   : > { %1496 = vtanh.f32 %v706_v61  ;;  %v1713_v61 = vmov 0  }
 0x168   : > { %1498 = vtanh.f32 %v707_v62  ;;  %1485 = vset.pattern.permute.xlu0 %v1713_v61  ;;  %1484 = vset.pattern.permute.xlu1 %v1713_v61  ;;  %v824_v62 = vsub.s32 1, %v1988_v20 }
 0x169   : > { %1500 = vtanh.f32 %v708_v63  ;;  %v828_v63 = vsub.s32 2, %v1988_v20 }
 0x16e   : > { %v1487_v1 = vpop.eup %1486 }
 0x16f   : > { %v724_v3 = vmul.f32 %v1487_v1, %v1357_v0 }
 0x170   : > { %v1489_v4 = vpop.eup %1488 }
 0x171   : > { %v1491_v6 = vpop.eup %1490  ;;  %v732_v7 = vsel %vm397_vm0, %v724_v3, 0.0  ;;  %v725_v8 = vmul.f32 %v1489_v4, %v1357_v0 }
 0x172   : > { %v1493_v10 = vpop.eup %1492  ;;  %733 = vadd.xlane.f32.xlu0 %v732_v7  ;;  %v726_v16 = vmul.f32 %v1491_v6, %v1357_v0  ;;  %v836_v7 = vsub.s32 4, %v1988_v20 }
 0x173   : > { %v1495_v17 = vpop.eup %1494  ;;  %v727_v21 = vmul.f32 %v1493_v10, %v1357_v0  ;;  %v735_v23 = vsel %vm397_vm0, %v725_v8, 0.0 }
 0x174   : > { %v738_v19 = vsel %vm397_vm0, %v726_v16, 0.0  ;;  %v1497_v22 = vpop.eup %1496  ;;  %v728_v24 = vmul.f32 %v1495_v17, %v1357_v0 }
 0x175   : > { %739 = vadd.xlane.f32.xlu1 %v738_v19  ;;  %v1499_v25 = vpop.eup %1498  ;;  %v741_v26 = vsel %vm397_vm0, %v727_v21, 0.0  ;;  %v729_v27 = vmul.f32 %v1497_v22, %v1357_v0  ;;  %v840_v22 = vsub.s32 5, %v1988_v20 }
 0x176   : > { %736 = vadd.xlane.f32.xlu0 %v735_v23  ;;  %v1501_v28 = vpop.eup %1500  ;;  %v744_v29 = vsel %vm397_vm0, %v728_v24, 0.0  ;;  %v730_v30 = vmul.f32 %v1499_v25, %v1357_v0 }
 0x177   : > { %v747_v31 = vsel %vm397_vm0, %v729_v27, 0.0  ;;  %v731_v33 = vmul.f32 %v1501_v28, %v1357_v0  ;;  %v832_v0 = vsub.s32 3, %v1988_v20 }
 0x178   : > { %v750_v34 = vsel %vm397_vm0, %v730_v30, 0.0  ;;  %v848_v30 = vsub.s32 7, %v1988_v20 }
 0x179   : > { %742 = vadd.xlane.f32.xlu1 %v741_v26  ;;  %v753_v35 = vsel %vm397_vm0, %v731_v33, 0.0  ;;  %v844_v26 = vsub.s32 6, %v1988_v20 }
 0x17a   : > { %745 = vadd.xlane.f32.xlu0 %v744_v29 }
 0x17d   : > { %748 = vadd.xlane.f32.xlu1 %v747_v31 }
 0x17e   : > { %751 = vadd.xlane.f32.xlu0 %v750_v34 }
 0x181   : > { %754 = vadd.xlane.f32.xlu1 %v753_v35 }
 0x1fb   : > { %v734_v37 = vpop.xlane.xlu0 %733 }
 0x1fc   : > { %v769_v41 = vrot.slane %v734_v37, %v2018_v38 }
 0x1fe   : > { %v740_v39 = vpop.xlane.xlu1 %739 }
 0x1ff   : > { %v737_v40 = vpop.xlane.xlu0 %736  ;;  %v777_v43 = vrot.slane %v740_v39, %v2018_v38 }
 0x200   : > { %v773_v42 = vrot.slane %v737_v40, %v2018_v38 }
 0x202   : > { %v799_v44 = vsel %vm798_vm3, %v773_v42, %v769_v41  ;;  %v743_v45 = vpop.xlane.xlu1 %742 }
 0x203   : > { %v801_v18 = vsel %vm800_vm4, %v777_v43, %v799_v44  ;;  %v781_v46 = vrot.slane %v743_v45, %v2018_v38  ;;  %v746_v47 = vpop.xlane.xlu0 %745 }
 0x204   : > { %v785_v48 = vrot.slane %v746_v47, %v2018_v38 }
 0x205   : > { %v803_v49 = vsel %vm802_vm5, %v781_v46, %v801_v18 }
 0x206   : > { %v805_v50 = vsel %vm804_vm6, %v785_v48, %v803_v49  ;;  %v749_v51 = vpop.xlane.xlu1 %748 }
 0x207   : > { %v789_v52 = vrot.slane %v749_v51, %v2018_v38  ;;  %v752_v53 = vpop.xlane.xlu0 %751 }
 0x208   : > { %v793_v54 = vrot.slane %v752_v53, %v2018_v38 }
 0x209   : > { %v807_v55 = vsel %vm806_vm7, %v789_v52, %v805_v50 }
 0x20a   : > { %v755_v56 = vpop.xlane.xlu1 %754  ;;  %v809_v57 = vsel %vm808_vm8, %v793_v54, %v807_v55 }
 0x20b   : > { %v797_v58 = vrot.slane %v755_v56, %v2018_v38 }
 0x20d   : > { %v811_v59 = vsel %vm810_vm9, %v797_v58, %v809_v57 }
 0x20e   : > { %v814_v60 = vsel %vm813_vm10, %v811_v59, -inf }
 0x20f   : > { %815 = vmax.xlane.f32.xlu0 %v814_v60 }
 0x298   : > { %v816_v1 = vpop.xlane.xlu0 %815 }
 0x299   : > { %v821_v3 = vrot.slane %v816_v1, %v1995_v32  ;;  %v825_v4 = vrot.slane %v816_v1, %v824_v62  ;;  %v829_v6 = vrot.slane %v816_v1, %v828_v63  ;;  %v833_v8 = vrot.slane %v816_v1, %v832_v0 }
 0x29a   : > { %v837_v23 = vrot.slane %v816_v1, %v836_v7  ;;  %v841_v27 = vrot.slane %v816_v1, %v840_v22  ;;  %v845_v31 = vrot.slane %v816_v1, %v844_v26  ;;  %v849_v35 = vrot.slane %v816_v1, %v848_v30 }
 0x29b   : > { %v858_v10 = vsub.f32 %v734_v37, %v821_v3  ;;  %v859_v16 = vsub.f32 %v737_v40, %v825_v4  ;;  %v860_v17 = vsub.f32 %v740_v39, %v829_v6  ;;  %v861_v24 = vsub.f32 %v743_v45, %v833_v8 }
 0x29c   : > { %v862_v28 = vsub.f32 %v746_v47, %v837_v23  ;;  %v863_v33 = vsub.f32 %v749_v51, %v841_v27  ;;  %v864_v36 = vsub.f32 %v752_v53, %v845_v31  ;;  %v865_v41 = vsub.f32 %v755_v56, %v849_v35 }
 0x29d   : > { %v866_v19 = vmul.f32 1.442695, %v858_v10  ;;  %v868_v21 = vmul.f32 1.442695, %v859_v16  ;;  %v870_v25 = vmul.f32 1.442695, %v860_v17 }
 0x29e   : > { %v872_v29 = vmul.f32 1.442695, %v861_v24  ;;  %v874_v34 = vmul.f32 1.442695, %v862_v28  ;;  %v876_v37 = vmul.f32 1.442695, %v863_v33 }
 0x29f   : > { %1502 = vpow2.f32 %v866_v19  ;;  %v878_v42 = vmul.f32 1.442695, %v864_v36  ;;  %v880_v44 = vmul.f32 1.442695, %v865_v41 }
 0x2a0   : > { %1504 = vpow2.f32 %v868_v21 }
 0x2a1   : > { %1506 = vpow2.f32 %v870_v25 }
 0x2a2   : > { %1508 = vpow2.f32 %v872_v29 }
 0x2a3   : > { %1510 = vpow2.f32 %v874_v34 }
 0x2a4   : > { %1512 = vpow2.f32 %v876_v37 }
 0x2a5   : > { %1514 = vpow2.f32 %v878_v42 }
 0x2a6   : > { %1516 = vpow2.f32 %v880_v44 }
 0x2ac   : > { %v1503_v39 = vpop.eup %1502 }
 0x2ad   : > { %v1505_v40 = vpop.eup %1504  ;;  %891 = vperm.xlu1 %1484, %v1503_v39  }
 0x2ae   : > { %894 = vperm.xlu0 %1485, %v1505_v40   ;;  %v1507_v43 = vpop.eup %1506 }
 0x2af   : > { %v1509_v45 = vpop.eup %1508 }
 0x2b0   : > { %v1511_v18 = vpop.eup %1510 }
 0x2b1   : > { %897 = vperm.xlu1 %1484, %v1507_v43   ;;  %v1513_v46 = vpop.eup %1512 }
 0x2b2   : > { %v1515_v47 = vpop.eup %1514 }
 0x2b3   : > { %v1517_v48 = vpop.eup %1516 }
 0x2b5   : > { %900 = vperm.xlu1 %1484, %v1509_v45  }
 0x2b9   : > { %903 = vperm.xlu1 %1484, %v1511_v18  }
 0x2bd   : > { %906 = vperm.xlu1 %1484, %v1513_v46  }
 0x2c1   : > { %909 = vperm.xlu1 %1484, %v1515_v47  }
 0x2c5   : > { %912 = vperm.xlu1 %1484, %v1517_v48  }
 0x328   : > { %v892_v49 = vpop.permute.xlu1 %891 }
 0x329   : > { %v895_v53 = vpop.permute.xlu0 %894  ;;  %v917_v56 = vrot.slane %v892_v49, %v2018_v38 }
 0x32a   : > { %v921_v55 = vrot.slane %v895_v53, %v2018_v38 }
 0x32c   : > { %v898_v50 = vpop.permute.xlu1 %897  ;;  %v946_v61 = vsel %vm798_vm3, %v921_v55, %v917_v56 }
 0x32d   : > { %v925_v57 = vrot.slane %v898_v50, %v2018_v38 }
 0x32f   : > { %v947_v3 = vsel %vm800_vm4, %v925_v57, %v946_v61 }
 0x330   : > { %v901_v51 = vpop.permute.xlu1 %900 }
 0x331   : > { %v929_v58 = vrot.slane %v901_v51, %v2018_v38 }
 0x333   : > { %v948_v6 = vsel %vm802_vm5, %v929_v58, %v947_v3 }
 0x334   : > { %v904_v52 = vpop.permute.xlu1 %903 }
 0x335   : > { %v933_v59 = vrot.slane %v904_v52, %v2018_v38 }
 0x337   : > { %v949_v8 = vsel %vm804_vm6, %v933_v59, %v948_v6 }
 0x338   : > { %v907_v54 = vpop.permute.xlu1 %906 }
 0x339   : > { %v937_v1 = vrot.slane %v907_v54, %v2018_v38 }
 0x33b   : > { %v950_v16 = vsel %vm806_vm7, %v937_v1, %v949_v8 }
 0x33c   : > { %v910_v60 = vpop.permute.xlu1 %909 }
 0x33d   : > { %v941_v4 = vrot.slane %v910_v60, %v2018_v38 }
 0x33f   : > { %v951_v19 = vsel %vm808_vm8, %v941_v4, %v950_v16 }
 0x340   : > { %v913_v10 = vpop.permute.xlu1 %912 }
 0x341   : > { %v945_v17 = vrot.slane %v913_v10, %v2018_v38 }
 0x343   : > { %v952_v21 = vsel %vm810_vm9, %v945_v17, %v951_v19 }
 0x344   : > { %v954_v23 = vsel %vm813_vm10, %v952_v21, 0.0 }
 0x345   : > { %955 = vadd.xlane.f32.xlu1 %v954_v23 }
 0x3ce   : > { %v956_v24 = vpop.xlane.xlu1 %955 }
 0x3cf   : > { %1518 = vrcp.f32 %v956_v24 }
 0x3dc   : > { %v1519_v25 = vpop.eup %1518 }
 0x3dd   : > { %v962_v27 = vrot.slane %v1519_v25, %v1995_v32  ;;  %v966_v29 = vrot.slane %v1519_v25, %v824_v62  ;;  %v970_v33 = vrot.slane %v1519_v25, %v828_v63  ;;  %v974_v35 = vrot.slane %v1519_v25, %v832_v0 }
 0x3de   : > { %v978_v37 = vrot.slane %v1519_v25, %v836_v7  ;;  %v982_v62 = vrot.slane %v1519_v25, %v840_v22  ;;  %v986_v63 = vrot.slane %v1519_v25, %v844_v26  ;;  %v990_v0 = vrot.slane %v1519_v25, %v848_v30 }
 0x3df   : > { %v999_v28 = vmul.f32 %v1503_v39, %v962_v27  ;;  %v1000_v31 = vmul.f32 %v1505_v40, %v966_v29  ;;  %v1001_v34 = vmul.f32 %v1507_v43, %v970_v33  ;;  %v1002_v36 = vmul.f32 %v1509_v45, %v974_v35 }
 0x3e0   : > { %v1003_v32 = vmul.f32 %v1511_v18, %v978_v37  ;;  %v1004_v39 = vmul.f32 %v1513_v46, %v982_v62  ;;  %v1005_v40 = vmul.f32 %v1515_v47, %v986_v63  ;;  %v1006_v41 = vmul.f32 %v1517_v48, %v990_v0 }
 0x3e1   : > { %1009 = vperm.xlu0 %1485, %v999_v28  }
 0x3e5   : > { %1014 = vperm.xlu0 %1485, %v1000_v31  }
 0x3e9   : > { %1019 = vperm.xlu0 %1485, %v1001_v34  }
 0x3ed   : > { %1024 = vperm.xlu0 %1485, %v1002_v36  }
 0x3f1   : > { %1029 = vperm.xlu0 %1485, %v1003_v32  }
 0x3f5   : > { %1034 = vperm.xlu0 %1485, %v1004_v39  }
 0x3f9   : > { %1039 = vperm.xlu0 %1485, %v1005_v40  }
 0x3fd   : > { %1044 = vperm.xlu0 %1485, %v1006_v41  }
 0x45c   : > { %v1010_v42 = vpop.permute.xlu0 %1009 }
 0x45d   : > { %v1047_v44 = vmul.f32 %v1010_v42, %v1957_v9  ;;  %v1131_v59 = vrot.slane %v1010_v42, %v2018_v38 }
 0x45f   : > { %v1055_v18 = vsel %vm397_vm0, %v1047_v44, 0.0 }
 0x460   : > { %v1015_v7 = vpop.permute.xlu0 %1014  ;;  %v1056_v48 = vrot.slane %v1055_v18, 4 }
 0x461   : > { %v1048_v43 = vmul.f32 %v1015_v7, %v1961_v11 }
 0x462   : > { %v1057_v52 = vadd.f32 %v1056_v48, %v1055_v18 }
 0x463   : > { %v1062_v26 = vsel %vm397_vm0, %v1048_v43, 0.0 }
 0x464   : > { %v1020_v22 = vpop.permute.xlu0 %1019  ;;  %v1063_v47 = vrot.slane %v1062_v26, 4 }
 0x465   : > { %v1049_v45 = vmul.f32 %v1020_v22, %v1964_v12  ;;  %v1139_v61 = vrot.slane %v1020_v22, %v2018_v38 }
 0x466   : > { %v1064_v12 = vadd.f32 %v1063_v47, %v1062_v26 }
 0x467   : > { %v1069_v20 = vsel %vm397_vm0, %v1049_v45, 0.0 }
 0x468   : > { %v1025_v30 = vpop.permute.xlu0 %1024  ;;  %v1070_v49 = vrot.slane %v1069_v20, 4  ;;  %v1065_v60 = vrot.slane %v1064_v12, 2 }
 0x469   : > { %v1050_v46 = vmul.f32 %v1025_v30, %v1973_v13  ;;  %v1135_v13 = vrot.slane %v1015_v7, %v2018_v38  ;;  %v1143_v4 = vrot.slane %v1025_v30, %v2018_v38 }
 0x46a   : > { %v1071_v53 = vadd.f32 %v1070_v49, %v1069_v20  ;;  %v1066_v24 = vadd.f32 %v1065_v60, %v1064_v12 }
 0x46b   : > { %v1076_v11 = vsel %vm397_vm0, %v1050_v46, 0.0  ;;  %v1160_v17 = vsel %vm798_vm3, %v1135_v13, %v1131_v59 }
 0x46c   : > { %v1077_v50 = vrot.slane %v1076_v11, 4  ;;  %v1030_v9 = vpop.permute.xlu0 %1029  ;;  %v1072_v3 = vrot.slane %v1071_v53, 2  ;;  %v1161_v25 = vsel %vm800_vm4, %v1139_v61, %v1160_v17  ;;  %v1067_v0 = vrot.slane %v1066_v24, 1 }
 0x46d   : > { %v1051_v51 = vmul.f32 %v1030_v9, %v1976_v14  ;;  %v1058_v14 = vrot.slane %v1057_v52, 2  ;;  %v1147_v10 = vrot.slane %v1030_v9, %v2018_v38  ;;  %v1162_v33 = vsel %vm802_vm5, %v1143_v4, %v1161_v25 }
 0x46e   : > { %v1078_v55 = vadd.f32 %v1077_v50, %v1076_v11  ;;  %v1073_v31 = vadd.f32 %v1072_v3, %v1071_v53 }
 0x46f   : > { %v1083_v54 = vsel %vm397_vm0, %v1051_v51, 0.0  ;;  %v1059_v29 = vadd.f32 %v1058_v14, %v1057_v52  ;;  %v1163_v36 = vsel %vm804_vm6, %v1147_v10, %v1162_v33 }
 0x470   : > { %v1084_v56 = vrot.slane %v1083_v54, 4  ;;  %v1035_v57 = vpop.permute.xlu0 %1034  ;;  %v1079_v8 = vrot.slane %v1078_v55, 2  ;;  %v1074_v43 = vrot.slane %v1073_v31, 1 }
 0x471   : > { %v1052_v58 = vmul.f32 %v1035_v57, %v1983_v15  ;;  %v1151_v21 = vrot.slane %v1035_v57, %v2018_v38  ;;  %v1060_v45 = vrot.slane %v1059_v29, 1 }
 0x472   : > { %v1085_v1 = vadd.f32 %v1084_v56, %v1083_v54  ;;  %v1080_v35 = vadd.f32 %v1079_v8, %v1078_v55  ;;  %v1075_v48 = vadd.f32 %v1074_v43, %v1073_v31 }
 0x473   : > { %v1090_v6 = vsel %vm397_vm0, %v1052_v58, 0.0  ;;  %v1164_v39 = vsel %vm806_vm7, %v1151_v21, %v1163_v36  ;;  %v1061_v49 = vadd.f32 %v1060_v45, %v1059_v29 }
 0x474   : > { %v1091_v16 = vrot.slane %v1090_v6, 4  ;;  %v1040_v15 = vpop.permute.xlu0 %1039  ;;  %v1086_v19 = vrot.slane %v1085_v1, 2  ;;  %v1081_v26 = vrot.slane %v1080_v35, 1 }
 0x475   : > { %v1053_v23 = vmul.f32 %v1040_v15, %v1947_v2  ;;  %v1155_v28 = vrot.slane %v1040_v15, %v2018_v38 }
 0x476   : > { %v1092_v27 = vadd.f32 %v1091_v16, %v1090_v6  ;;  %v1087_v2 = vadd.f32 %v1086_v19, %v1085_v1  ;;  %v1082_v11 = vadd.f32 %v1081_v26, %v1080_v35 }
 0x477   : > { %v1097_v34 = vsel %vm397_vm0, %v1053_v23, 0.0  ;;  %v1165_v7 = vsel %vm808_vm8, %v1155_v28, %v1164_v39 }
 0x478   : > { %v1093_v37 = vrot.slane %v1092_v27, 2  ;;  %v1098_v32 = vrot.slane %v1097_v34, 4  ;;  %v1045_v62 = vpop.permute.xlu0 %1044  ;;  %v1088_v30 = vrot.slane %v1087_v2, 1 }
 0x479   : > { %v1054_v63 = vmul.f32 %v1045_v62, %v1952_v5  ;;  %v1159_v40 = vrot.slane %v1045_v62, %v2018_v38  ;;  %v1068_v5 = vadd.f32 %v1067_v0, %v1066_v24 }
 0x47a   : > { %v1094_v41 = vadd.f32 %v1093_v37, %v1092_v27  ;;  %v1099_v42 = vadd.f32 %v1098_v32, %v1097_v34  ;;  %v1089_v51 = vadd.f32 %v1088_v30, %v1087_v2 }
 0x47b   : > { %v1104_v44 = vsel %vm397_vm0, %v1054_v63, 0.0  ;;  %v1166_v22 = vsel %vm810_vm9, %v1159_v40, %v1165_v7  ;;  %v1119_v12 = vsel %vm798_vm3, %v1068_v5, %v1061_v49 }
 0x47c   : > { %v1100_v18 = vrot.slane %v1099_v42, 2  ;;  %v1105_v20 = vrot.slane %v1104_v44, 4  ;;  %1168 = vst.msk [vmem:[%s384_s20] sm:$0xff] %vm813_vm10, %v1166_v22  ;;  %v1095_v46 = vrot.slane %v1094_v41, 1  ;;  %v1120_v54 = vsel %vm800_vm4, %v1075_v48, %v1119_v12 }
 0x47d   : > { %v1121_v56 = vsel %vm802_vm5, %v1082_v11, %v1120_v54 }
 0x47e   : > { %v1101_v38 = vadd.f32 %v1100_v18, %v1099_v42  ;;  %v1106_v47 = vadd.f32 %v1105_v20, %v1104_v44  ;;  %v1096_v52 = vadd.f32 %v1095_v46, %v1094_v41  ;;  %v1122_v13 = vsel %vm804_vm6, %v1089_v51, %v1121_v56 }
 0x480   : > { %v1102_v50 = vrot.slane %v1101_v38, 1  ;;  %v1107_v9 = vrot.slane %v1106_v47, 2  ;;  %v1123_v58 = vsel %vm806_vm7, %v1096_v52, %v1122_v13 }
 0x482   : > { %v1108_v53 = vadd.f32 %v1107_v9, %v1106_v47  ;;  %v1103_v55 = vadd.f32 %v1102_v50, %v1101_v38 }
 0x484   : > { %v1109_v57 = vrot.slane %v1108_v53, 1  ;;  %v1124_v60 = vsel %vm808_vm8, %v1103_v55, %v1123_v58 }
 0x486   : > { %v1110_v59 = vadd.f32 %v1109_v57, %v1108_v53 }
 0x488   : > { %v1125_v61 = vsel %vm810_vm9, %v1110_v59, %v1124_v60 }
 0x489   : > { %1127 = vst.msk [vmem:[%s369_s19] sm:$0xff] %vm397_vm0, %v1125_v61 }
 0x48a   : > { %1637 = shalt.err (!%p1634_p6)
}
 0x48b   : > { %s1638_s8 = scalar_lea.hbm %s2141_s15, 128  ;;  %s1642_s3 = scalar_lea.hbm %s2186_s6, 256 }
 0x48c   : > { %p1639_p0 = scmp.ne.s32.totalorder %s2141_s15, %s1638_s8  ;;  %p1643_p1 = scmp.lt.s32.totalorder %s2141_s15, %s2186_s6 }
 0x48d   : > { %p1644_p3 = scmp.lt.s32.totalorder %s1642_s3, %s1638_s8 }
 0x48e   : > { %p1640_p5 = pnand %p1639_p0, %p2210_p12 }
 0x48f   : > { %p1645_p7 = por %p1644_p3, %p1643_p1 }
 0x490   : > { %p1641_p13 = pneg %p1640_p5 }
 0x492   : > { %p1646_p9 = pnand %p1645_p7, %p1641_p13 }
 0x494   : > { %1649 = shalt.err (!%p1646_p9)
}
 0x495   : > { %1424 = dma.vmem_to_hbm [thread:$0]  (%p2210_p12), %s1188_s22, 128, %s2141_s15, %s1170_s28  }
 0x496 PF: > { %s1202_s10 = sand.u32 1, %s1688_s24   ;;  %p2211_p4 = scmp.ne.s32.totalorder %s2199_s14, 0 }
 0x497   : > { %p2212_p11 = scmp.ge.s32.totalorder %s1700_s27, 2  ;;  %s1203_s20 = scalar_lea.sflag [#allocation4], %s1202_s10 }
 0x499   : > { %p1434_p2 = pnand %p2212_p11, %p2211_p4 }
 0x49b   : > { %p1435_p10 = pneg %p1434_p2 }
 0x49d   : > { %1683 = dma.done.wait (%p1435_p10), %s1203_s20, 128  }
 0x49e   : > { %1685 = vsyncadd (%p1435_p10), %s1203_s20, 4294967168  ;;  %s2213_s23 = sld [smem:[#allocation16_spill]]  ;;  %p25_p8 = scmp.ge.s32.totalorder %s1780_s30, 4  }
 0x49f   : > { %s2214_s24 = smov %s1692_s25  ;;  %s2215_s25 = smov %s1696_s26 }
 0x4a0   : > { %s2217_s27 = smov %s1780_s30  ;;  %27 = sbr.rel (!%p25_p8) target bundleno = 12 (0xc), region = 122 }
 0x4a4   : > { %s2216_s26 = smov %s2213_s23 }
 0x4a5   :  { %1215 = vsyncpa [#allocation3], 1 }
 0x4a6   :  { %1217 = vsyncpa [#allocation3 + $0x1], 1 }
 0x4a7   :  { %1218 = vsyncpa [#allocation6], 1 }
 0x4a8   :  { %1220 = vsyncpa [#allocation6 + $0x1], 1 }
 0x4a9   :  { %1221 = vsyncpa [#allocation9], 1 }
 0x4aa   :  { %1222 = vsyncpa [#allocation4], 1 }
 0x4ab   :  { %1224 = vsyncpa [#allocation4 + $0x1], 1 }

</bundles_post_ra>
